<compile_context>
chip_gen: v7x
topology: tpu7x:2x2x1
jax: 0.10.0
libtpu: 0.0.40
codegen_flags: <defaults>
</compile_context>

<pallas_src>
import math

import jax
import jax.numpy as jnp
import numpy as np
from jax.experimental import pallas as pl
from jax.experimental.pallas import tpu as pltpu


# ----------------------------------------------------------------------------
# Kernel
# ----------------------------------------------------------------------------
def _upsample_kernel(x_ref, w_ref, b_ref, o_ref):
    # x_ref: (tm, W, Cin)     -- tm (b,h) row-groups, W spatial columns each
    # w_ref: (Cin, s*s*Cout)  -- columns ordered (kh, kw, oc), kh-major
    # b_ref: (1, s*s*Cout)    -- f32 bias tiled per (kh, kw)
    # o_ref: (tm, s, W, s*Cout)
    tm, s, w_cols, s_cout = o_ref.shape
    cin = x_ref.shape[-1]

    # Leading-dim collapse (layout-preserving when W % 8 == 0; otherwise a
    # cheap VMEM relayout, never an HBM round trip).
    xm = x_ref[...].reshape(tm * w_cols, cin)

    # One wide matmul: N = s*s*Cout fills the 256-wide MXU on v6e/v7x and x is
    # consumed once per tile (kh no longer re-reads it).
    y = jnp.dot(xm, w_ref[...], preferred_element_type=jnp.float32)
    y = y + b_ref[...]

    # Scatter each kh slice to its final row offset: lane-aligned column slice
    # + leading-dim reshape + static-slice store, all VMEM-local.
    for kh in range(s):
        o_ref[:, kh:kh + 1, :, :] = (
            y[:, kh * s_cout:(kh + 1) * s_cout]
            .reshape(tm, 1, w_cols, s_cout)
            .astype(o_ref.dtype))


# ----------------------------------------------------------------------------
# Tiling helper
# ----------------------------------------------------------------------------
def _pick_group_tile(n_groups, rows_per_group, bytes_per_group, fixed_bytes,
                     *, row_align=8, row_target=2048,
                     budget_bytes=20 * 1024 * 1024):
    """Largest divisor `tm` of n_groups such that the double-buffered working
    set (bytes_per_group * tm + fixed_bytes) fits `budget_bytes` and
    tm*rows_per_group stays near `row_target` rows (big enough to amortize the
    ~0.35us per-grid-step overhead).  Prefers sublane-aligned row counts and
    never falls back to an over-budget full-extent block."""
    budget_groups = max(1, (budget_bytes - fixed_bytes) // max(bytes_per_group, 1))
    target_groups = max(1, -(-row_target // max(rows_per_group, 1)))   # ceil
    limit = max(1, min(budget_groups, target_groups))
    best_any, best_aligned = 1, 0
    for d in range(1, min(limit, n_groups) + 1):
        if n_groups % d:
            continue
        best_any = d
        if (d * rows_per_group) % row_align == 0:
            best_aligned = d
    return best_aligned if best_aligned else best_any


# ----------------------------------------------------------------------------
# Forward
# ----------------------------------------------------------------------------
def upsample_forward(x, weight, bias, upscale):
    """Forward of Upsample.

    x:      (B, L, C_in) with L = H*W (square spatial grid)
    weight: (C_in, C_out, s, s)  -- nn.ConvTranspose2d weight layout
    bias:   (C_out,)
    returns (B, L*s*s, C_out)
    """
    B, L, Cin = x.shape
    H = W = math.isqrt(L)
    assert H * W == L, "sequence length must be a perfect square"
    s = int(upscale)
    Cout = weight.shape[1]
    sC = s * Cout
    K = s * sC
    BH = B * H
    x_itemsize = jnp.dtype(x.dtype).itemsize

    # Free views / small host-side reorders of the tiny weight & bias.
    x3 = x.reshape(BH, W, Cin)
    # (Cin, Cout, kh, kw) -> (Cin, kh, kw, Cout) -> (Cin, s*s*Cout), kh-major.
    w_mat = jnp.transpose(weight, (0, 2, 3, 1)).reshape(Cin, K).astype(x.dtype)
    b_mat = jnp.tile(bias, s * s).reshape(1, K).astype(jnp.float32)

    # Explicit VMEM accounting per (b,h) row-group of W tokens:
    #   x block + out block double-buffered, plus the f32 matmul result.
    bytes_per_group = (2 * W * Cin * x_itemsize
                       + 2 * W * K * x_itemsize
                       + W * K * 4)
    # Grid-constant weight/bias blocks (counted double-buffered) + margin.
    # TODO(synk): single-buffer the grid-constant weight (pl.Buffered(1)) to
    # reclaim VMEM for even larger M tiles on very wide channel counts.
    fixed_bytes = 2 * (Cin * K * x_itemsize + K * 4) + (512 << 10)

    tm = _pick_group_tile(BH, W, bytes_per_group, fixed_bytes,
                          row_align=max(8, 32 // x_itemsize))
    num_i = BH // tm

    flops = 2 * BH * W * Cin * K
    bytes_accessed = (x.size * x_itemsize            # x read exactly once
                      + w_mat.size * x_itemsize
                      + b_mat.size * 4
                      + BH * s * W * sC * x_itemsize)

    out = pl.pallas_call(
        _upsample_kernel,
        out_shape=jax.ShapeDtypeStruct((BH, s, W, sC), x.dtype),
        grid_spec=pltpu.PrefetchScalarGridSpec(
            num_scalar_prefetch=0,
            grid=(num_i,),
            in_specs=[
                # Trailing block dims equal the full array extents -> legal
                # for any W (no (8,128) divisibility requirement).
                pl.BlockSpec((tm, W, Cin), lambda i: (i, 0, 0)),
                pl.BlockSpec((Cin, K), lambda i: (0, 0)),
                pl.BlockSpec((1, K), lambda i: (0, 0)),
            ],
            out_specs=pl.BlockSpec((tm, s, W, sC), lambda i: (i, 0, 0, 0)),
        ),
        compiler_params=pltpu.CompilerParams(
            dimension_semantics=("parallel",),
            vmem_limit_bytes=32 * 1024 * 1024),
        cost_estimate=pl.CostEstimate(flops=int(flops), transcendentals=0,
                                      bytes_accessed=int(bytes_accessed)),
    )(x3, w_mat, b_mat)

    # out index order is (b, h, kh, w, kw, oc): the ConvTranspose2d +
    # flatten(2).transpose(1,2) sequence layout is a pure reshape.
    return out.reshape(B, H * s * W * s, Cout)


# ----------------------------------------------------------------------------
# Test
# ----------------------------------------------------------------------------
if __name__ == "__main__":
    key = jax.random.PRNGKey(0)
    k1, k2, k3 = jax.random.split(key, 3)

    # Small but TPU-friendly shapes: H = W = 8 (L = 64), Cin = 128, Cout = 64,
    # upscale = 2 -> matmul N = 256 (fills v6e/v7x MXU), lane-dense stores.
    B, H, W, Cin, Cout, s = 2, 8, 8, 128, 64, 2
    L = H * W
    x = jax.random.normal(k1, (B, L, Cin), jnp.float32)
    weight = jax.random.normal(k2, (Cin, Cout, s, s), jnp.float32) * 0.1
    bias = jax.random.normal(k3, (Cout,), jnp.float32) * 0.1

    out = upsample_forward(x, weight, bias, s)
    out = jax.block_until_ready(out)

    # Reference: ConvTranspose2d(k=s, stride=s) on (B, Cin, H, W), then
    # flatten(2).transpose(1, 2):  out[b, (h*s+kh)*(W*s) + (w*s+kw), oc]
    xn = np.asarray(x, np.float64)
    wn = np.asarray(weight, np.float64)
    bn = np.asarray(bias, np.float64)
    x_sp = xn.reshape(B, H, W, Cin)
    ref6 = np.einsum("bhwi,iokl->bhkwlo", x_sp, wn) + bn   # (B,H,kh,W,kw,Cout)
    ref = ref6.reshape(B, H * s * W * s, Cout)

    np.testing.assert_allclose(np.asarray(out, np.float64), ref,
                               rtol=1e-3, atol=1e-3)
    print("KERNEL_OK")
</pallas_src>

<mosaic_0001>
module attributes {stable_mosaic.version = 11 : i64} {
  func.func @_upsample_kernel(%arg0: i32, %arg1: memref<16x8x128xf32, #tpu.memory_space<vmem>>, %arg2: memref<128x256xf32, #tpu.memory_space<vmem>>, %arg3: memref<1x256xf32, #tpu.memory_space<vmem>>, %arg4: memref<16x2x8x128xf32, #tpu.memory_space<vmem>>) attributes {dimension_semantics = [#tpu.dimension_semantics<parallel>], iteration_bounds = array<i64: 1>, scalar_prefetch = 0 : i64, scratch_operands = 0 : i64, tpu.core_type = #tpu.core_type<tc>, window_params = [{transform_indices = @transform_0, window_bounds = array<i64: 16, 8, 128>}, {pipeline_mode = #tpu.pipeline_mode<synchronous>, transform_indices = @transform_1, window_bounds = array<i64: 128, 256>}, {pipeline_mode = #tpu.pipeline_mode<synchronous>, transform_indices = @transform_2, window_bounds = array<i64: 1, 256>}, {transform_indices = @transform_3, window_bounds = array<i64: 16, 2, 8, 128>}]} {
    %c0 = arith.constant 0 : index
    %c0_0 = arith.constant 0 : index
    %c0_1 = arith.constant 0 : index
    %0 = vector.load %arg1[%c0, %c0_0, %c0_1] : memref<16x8x128xf32, #tpu.memory_space<vmem>>, vector<16x8x128xf32>
    %1 = vector.shape_cast %0 : vector<16x8x128xf32> to vector<128x128xf32>
    %c0_2 = arith.constant 0 : index
    %c0_3 = arith.constant 0 : index
    %2 = vector.load %arg2[%c0_2, %c0_3] : memref<128x256xf32, #tpu.memory_space<vmem>>, vector<128x256xf32>
    %cst = arith.constant dense<0.000000e+00> : vector<128x256xf32>
    %3 = tpu.matmul %1, %2, %cst {dimension_numbers = #tpu.dot_dimension_numbers<[1], [0], [0], [1], [0, 0, 1, 1], [], []>} : vector<128x128xf32>, vector<128x256xf32>, vector<128x256xf32> -> vector<128x256xf32>
    %c0_4 = arith.constant 0 : index
    %c0_5 = arith.constant 0 : index
    %4 = vector.load %arg3[%c0_4, %c0_5] : memref<1x256xf32, #tpu.memory_space<vmem>>, vector<1x256xf32>
    %5 = vector.broadcast %4 : vector<1x256xf32> to vector<128x256xf32>
    %6 = arith.addf %3, %5 : vector<128x256xf32>
    %7 = vector.extract_strided_slice %6 {offsets = [0, 0], sizes = [128, 128], strides = [1, 1]} : vector<128x256xf32> to vector<128x128xf32>
    %8 = vector.shape_cast %7 : vector<128x128xf32> to vector<16x1x8x128xf32>
    %c0_6 = arith.constant 0 : index
    %c0_7 = arith.constant 0 : index
    %c0_8 = arith.constant 0 : index
    %c0_9 = arith.constant 0 : index
    %9 = vector.load %arg4[%c0_6, %c0_7, %c0_8, %c0_9] : memref<16x2x8x128xf32, #tpu.memory_space<vmem>>, vector<16x1x8x128xf32>
    tpu.vector_store %arg4[%c0_6, %c0_7, %c0_8, %c0_9], %8 {strides = array<i32>} : memref<16x2x8x128xf32, #tpu.memory_space<vmem>>, vector<16x1x8x128xf32>,
    %10 = vector.extract_strided_slice %6 {offsets = [0, 128], sizes = [128, 128], strides = [1, 1]} : vector<128x256xf32> to vector<128x128xf32>
    %11 = vector.shape_cast %10 : vector<128x128xf32> to vector<16x1x8x128xf32>
    %c0_10 = arith.constant 0 : index
    %c1 = arith.constant 1 : index
    %c0_11 = arith.constant 0 : index
    %c0_12 = arith.constant 0 : index
    %12 = vector.load %arg4[%c0_10, %c1, %c0_11, %c0_12] : memref<16x2x8x128xf32, #tpu.memory_space<vmem>>, vector<16x1x8x128xf32>
    tpu.vector_store %arg4[%c0_10, %c1, %c0_11, %c0_12], %11 {strides = array<i32>} : memref<16x2x8x128xf32, #tpu.memory_space<vmem>>, vector<16x1x8x128xf32>,
    return
  }
  func.func @transform_0(%arg0: i32) -> (i32, i32, i32) {
    %c0_i32 = arith.constant 0 : i32
    %c0_i32_0 = arith.constant 0 : i32
    %c0_i32_1 = arith.constant 0 : i32
    return %arg0, %c0_i32, %c0_i32_0 : i32, i32, i32
  }
  func.func @transform_1(%arg0: i32) -> (i32, i32) {
    %c0_i32 = arith.constant 0 : i32
    %c0_i32_0 = arith.constant 0 : i32
    %c0_i32_1 = arith.constant 0 : i32
    return %c0_i32, %c0_i32_0 : i32, i32
  }
  func.func @transform_2(%arg0: i32) -> (i32, i32) {
    %c0_i32 = arith.constant 0 : i32
    %c0_i32_0 = arith.constant 0 : i32
    %c0_i32_1 = arith.constant 0 : i32
    return %c0_i32, %c0_i32_0 : i32, i32
  }
  func.func @transform_3(%arg0: i32) -> (i32, i32, i32, i32) {
    %c0_i32 = arith.constant 0 : i32
    %c0_i32_0 = arith.constant 0 : i32
    %c0_i32_1 = arith.constant 0 : i32
    %c0_i32_2 = arith.constant 0 : i32
    return %arg0, %c0_i32, %c0_i32_0, %c0_i32_1 : i32, i32, i32, i32
  }
}

</mosaic_0001>

<bundles_post_ra>
// kernel: tpu_custom_call.1
= control target key start
LH: loop header
LB: loop body
LE: loop exit
PB: predicated region body
PF: predicated region fallthrough
CT: control target
= control target key end

     0   :  { %8 = vsyncpa [#allocation3], 0  ;;  %s568_s0 = inlined_call_operand.hbm [shape: f32[16,8,128], index: 0, kind: input, shape index: {}]   ;;  %s569_s1 = inlined_call_operand.hbm [shape: f32[128,256], index: 1, kind: input, shape index: {}]   ;;  %s570_s2 = inlined_call_operand.vmem [shape: f32[1,256], index: 2, kind: input, shape index: {}]   ;;  %s571_s3 = inlined_call_operand.hbm [shape: f32[16,2,8,128], index: 3, kind: output, shape index: {}]  }
   0x1   :  { %9 = vsyncpa [#allocation6], 0 }
   0x2   :  { %10 = vsyncpa [#allocation4], 0  ;;  %s443_s12 = smov [#allocation2]   ;;  %s371_s16 = scalar_lea.hbm %s568_s0, 2048 }
   0x3   :  { %s16_s13 = sshll.u32 %s443_s12, 4  ;;  %p372_p0 = scmp.ne.s32.totalorder %s568_s0, %s371_s16  ;;  %s17_s13 = int_to_ptr.vmem [resolvable:$true] %s16_s13 }
   0x4   :  { %p375_p1 = scmp.lt.u32.totalorder %s371_s16, %s568_s0 }
   0x6   :  { %p377_p2 = pnand %p375_p1, %p372_p0 }
   0x8   :  { %380 = shalt.err (!%p377_p2)
}
   0x9   :  { %s381_s21 = scalar_lea.vmem %s17_s13, 2048  ;;  %p386_p4 = scmp.lt.s32.totalorder %s17_s13, %s17_s13 }
   0xa   :  { %p382_p3 = scmp.ne.s32.totalorder %s17_s13, %s381_s21  ;;  %p387_p5 = scmp.lt.s32.totalorder %s381_s21, %s381_s21 }
   0xc   :  { %p388_p6 = por %p387_p5, %p386_p4 }
   0xe   :  { %p389_p7 = pnand %p388_p6, %p382_p3 }
  0x10   :  { %392 = shalt.err (!%p389_p7)
}
  0x11   :  { %s444_s22 = smov 128   ;;  %s445_s23 = smov 8  }
  0x12   :  { %22 = dma.hbm_to_vmem [thread:$0]  %s568_s0, 2048, %s17_s13, [#allocation3], %s444_s22, %s444_s22, %s445_s23  }
  0x13   :  { %s446_s26 = smov [#allocation5]   ;;  %s393_s30 = scalar_lea.hbm %s569_s1, 4096 }
  0x14   :  { %s28_s27 = sshll.u32 %s446_s26, 4  ;;  %p394_p8 = scmp.ne.s32.totalorder %s569_s1, %s393_s30  ;;  %s29_s27 = int_to_ptr.vmem [resolvable:$true] %s28_s27 }
  0x15   :  { %p397_p9 = scmp.lt.u32.totalorder %s393_s30, %s569_s1 }
  0x17   :  { %p399_p10 = pnand %p397_p9, %p394_p8 }
  0x19   :  { %402 = shalt.err (!%p399_p10)
}
  0x1a   :  { %s403_s8 = scalar_lea.vmem %s29_s27, 4096  ;;  %p408_p12 = scmp.lt.s32.totalorder %s29_s27, %s29_s27 }
  0x1b   :  { %p404_p11 = scmp.ne.s32.totalorder %s29_s27, %s403_s8  ;;  %p409_p13 = scmp.lt.s32.totalorder %s403_s8, %s403_s8 }
  0x1d   :  { %p410_p0 = por %p409_p13, %p408_p12 }
  0x1f   :  { %p411_p1 = pnand %p410_p0, %p404_p11 }
  0x21   :  { %414 = shalt.err (!%p411_p1)
}
  0x22   :  { %s447_s0 = smov 256   ;;  %s448_s9 = smov 16  }
  0x23   :  { %34 = dma.hbm_to_vmem [thread:$0]  %s569_s1, 4096, %s29_s27, [#allocation6], %s447_s0, %s447_s0, %s448_s9  }
  0x24   :  { %437 = dma.done.wait [#allocation3], 2048  }
  0x25   :  { %438 = vsyncadd [#allocation3], 4294965248 }
  0x26   :  { %439 = dma.done.wait [#allocation6], 4096  }
  0x27   :  { %440 = vsyncadd [#allocation6], 4294963200  ;;  %v449_v0 = vmov 0.0   ;;  %v60_v1 = vld [vmem:[#allocation5 + $0x8] sm:$0xff]  ;;  %v62_v2 = vld [vmem:[#allocation5 + $0x18] sm:$0xff] }
  0x28   :  { %167 = vmatprep.mubr.f32.mxu0 %v449_v0  ;;  %215 = vmatprep.mubr.f32.mxu1 %v449_v0  ;;  %v59_v3 = vld [vmem:[#allocation5] sm:$0xff]  ;;  %v315_v4 = vpack.c.bf16 %v62_v2, %v60_v1  ;;  %v61_v5 = vld [vmem:[#allocation5 + $0x10] sm:$0xff]  ;;  %v64_v6 = vld [vmem:[#allocation5 + $0x28] sm:$0xff]  ;;  %v93_v2 = vlaneseq }
  0x29   :  { %v66_v7 = vld [vmem:[#allocation5 + $0x38] sm:$0xff]  ;;  %v317_v8 = vpack.c.bf16 %v61_v5, %v59_v3  ;;  %v63_v10 = vld [vmem:[#allocation5 + $0x20] sm:$0xff]  ;;  %v65_v11 = vld [vmem:[#allocation5 + $0x30] sm:$0xff] }
  0x2a   :  { %v319_v9 = vpack.c.bf16 %v66_v7, %v64_v6  ;;  %v68_v12 = vld [vmem:[#allocation5 + $0x48] sm:$0xff]  ;;  %316 = vmatprep.subr.bf16.mxu0 %v315_v4  ;;  %347 = vmatprep.subr.bf16.mxu1 %v315_v4  ;;  %v70_v13 = vld [vmem:[#allocation5 + $0x58] sm:$0xff]  ;;  %v321_v14 = vpack.c.bf16 %v65_v11, %v63_v10  ;;  %v67_v16 = vld [vmem:[#allocation5 + $0x40] sm:$0xff]  ;;  %v94_v3 = vshrl.u32 %v93_v2, 7 }
  0x2b   :  { %318 = vmatpush1.bf16.msra.mxu0 %v317_v8  ;;  %355 = vmatpush1.bf16.msra.mxu1 %v317_v8  ;;  %v323_v15 = vpack.c.bf16 %v70_v13, %v68_v12  ;;  %v69_v17 = vld [vmem:[#allocation5 + $0x50] sm:$0xff]  ;;  %v72_v18 = vld [vmem:[#allocation5 + $0x68] sm:$0xff]  ;;  %v74_v19 = vld [vmem:[#allocation5 + $0x78] sm:$0xff] }
  0x2c   :  { %320 = vmatprep.subr.bf16.mxu0 %v319_v9  ;;  %348 = vmatprep.subr.bf16.mxu1 %v319_v9  ;;  %v325_v20 = vpack.c.bf16 %v69_v17, %v67_v16  ;;  %v327_v21 = vpack.c.bf16 %v74_v19, %v72_v18  ;;  %v71_v22 = vld [vmem:[#allocation5 + $0x60] sm:$0xff]  ;;  %v73_v23 = vld [vmem:[#allocation5 + $0x70] sm:$0xff]  ;;  %v76_v24 = vld [vmem:[#allocation5 + $0x88] sm:$0xff]  ;;  %v95_v4 = vsub.s32 0, %v94_v3  ;;  %v99_v6 = vsub.s32 1, %v94_v3 }
  0x2d   :  { %v78_v25 = vld [vmem:[#allocation5 + $0x98] sm:$0xff]  ;;  %v329_v26 = vpack.c.bf16 %v73_v23, %v71_v22  ;;  %v75_v28 = vld [vmem:[#allocation5 + $0x80] sm:$0xff]  ;;  %v77_v29 = vld [vmem:[#allocation5 + $0x90] sm:$0xff] }
  0x2e   :  { %v331_v27 = vpack.c.bf16 %v78_v25, %v76_v24  ;;  %v80_v30 = vld [vmem:[#allocation5 + $0xa8] sm:$0xff]  ;;  %v82_v31 = vld [vmem:[#allocation5 + $0xb8] sm:$0xff]  ;;  %v333_v32 = vpack.c.bf16 %v77_v29, %v75_v28  ;;  %v79_v34 = vld [vmem:[#allocation5 + $0xa0] sm:$0xff] }
  0x2f   :  { %322 = vmatpush1.bf16.msra.mxu0 %v321_v14  ;;  %356 = vmatpush1.bf16.msra.mxu1 %v321_v14  ;;  %v335_v33 = vpack.c.bf16 %v82_v31, %v80_v30  ;;  %v81_v35 = vld [vmem:[#allocation5 + $0xb0] sm:$0xff]  ;;  %v84_v36 = vld [vmem:[#allocation5 + $0xc8] sm:$0xff]  ;;  %v86_v37 = vld [vmem:[#allocation5 + $0xd8] sm:$0xff] }
  0x30   :  { %324 = vmatprep.subr.bf16.mxu0 %v323_v15  ;;  %349 = vmatprep.subr.bf16.mxu1 %v323_v15  ;;  %v337_v38 = vpack.c.bf16 %v81_v35, %v79_v34  ;;  %v339_v39 = vpack.c.bf16 %v86_v37, %v84_v36  ;;  %v83_v40 = vld [vmem:[#allocation5 + $0xc0] sm:$0xff]  ;;  %v85_v41 = vld [vmem:[#allocation5 + $0xd0] sm:$0xff]  ;;  %v88_v42 = vld [vmem:[#allocation5 + $0xe8] sm:$0xff] }
  0x31   :  { %v90_v43 = vld [vmem:[#allocation5 + $0xf8] sm:$0xff]  ;;  %v341_v44 = vpack.c.bf16 %v85_v41, %v83_v40  ;;  %v87_v46 = vld [vmem:[#allocation5 + $0xe0] sm:$0xff]  ;;  %v89_v47 = vld [vmem:[#allocation5 + $0xf0] sm:$0xff] }
  0x32   :  { %v343_v45 = vpack.c.bf16 %v90_v43, %v88_v42  ;;  %v345_v48 = vpack.c.bf16 %v89_v47, %v87_v46  ;;  %v43_v49 = vld [vmem:[#allocation2] sm:$0xff]  ;;  %v44_v51 = vld [vmem:[#allocation2 + $0x8] sm:$0xff]  ;;  %v45_v53 = vld [vmem:[#allocation2 + $0x10] sm:$0xff] }
  0x33   :  { %326 = vmatpush1.bf16.msra.mxu0 %v325_v20  ;;  %357 = vmatpush1.bf16.msra.mxu1 %v325_v20  ;;  %v51_v50 = vld [vmem:[#allocation2 + $0x40] sm:$0xff]  ;;  %v52_v52 = vld [vmem:[#allocation2 + $0x48] sm:$0xff]  ;;  %v53_v54 = vld [vmem:[#allocation2 + $0x50] sm:$0xff] }
  0x34   :  { %328 = vmatprep.subr.bf16.mxu0 %v327_v21  ;;  %350 = vmatprep.subr.bf16.mxu1 %v327_v21  ;;  %v46_v55 = vld [vmem:[#allocation2 + $0x18] sm:$0xff]  ;;  %v47_v57 = vld [vmem:[#allocation2 + $0x20] sm:$0xff]  ;;  %v48_v59 = vld [vmem:[#allocation2 + $0x28] sm:$0xff] }
  0x35   :  { %v54_v56 = vld [vmem:[#allocation2 + $0x58] sm:$0xff]  ;;  %v55_v58 = vld [vmem:[#allocation2 + $0x60] sm:$0xff]  ;;  %v56_v60 = vld [vmem:[#allocation2 + $0x68] sm:$0xff] }
  0x36   :  { %v49_v61 = vld [vmem:[#allocation2 + $0x30] sm:$0xff]  ;;  %v50_v63 = vld [vmem:[#allocation2 + $0x38] sm:$0xff]  ;;  %v91_v5 = vld [vmem:[%s570_s2] sm:$0x3]  ;;  %s450_s2 = smov [#allocation7]  }
  0x37   :  { %330 = vmatpush1.bf16.msra.mxu0 %v329_v26  ;;  %358 = vmatpush1.bf16.msra.mxu1 %v329_v26  ;;  %v57_v62 = vld [vmem:[#allocation2 + $0x70] sm:$0xff]  ;;  %v58_v1 = vld [vmem:[#allocation2 + $0x78] sm:$0xff]  ;;  %v517_v7 = vrot.slane %v91_v5, %v95_v4  ;;  %v519_v8 = vrot.slane %v91_v5, %v99_v6  ;;  %s302_s13 = sshll.u32 %s450_s2, 4  ;;  %s303_s13 = int_to_ptr.vmem [resolvable:$true] %s302_s13 }
  0x38   :  { %332 = vmatprep.subr.bf16.mxu0 %v331_v27  ;;  %351 = vmatprep.subr.bf16.mxu1 %v331_v27  ;;  %s415_s14 = scalar_lea.vmem %s303_s13, 4096  ;;  %p420_p3 = scmp.lt.s32.totalorder %s303_s13, %s303_s13 }
  0x39   :  { %p416_p2 = scmp.ne.s32.totalorder %s303_s13, %s415_s14  ;;  %p421_p4 = scmp.lt.s32.totalorder %s415_s14, %s415_s14 }
  0x3b   :  { %334 = vmatpush1.bf16.msra.mxu0 %v333_v32  ;;  %359 = vmatpush1.bf16.msra.mxu1 %v333_v32  ;;  %p422_p5 = por %p421_p4, %p420_p3 }
  0x3c   :  { %336 = vmatprep.subr.bf16.mxu0 %v335_v33  ;;  %352 = vmatprep.subr.bf16.mxu1 %v335_v33 }
  0x3d   :  { %p423_p6 = pnand %p422_p5, %p416_p2 }
  0x3f   :  { %338 = vmatpush1.bf16.msra.mxu0 %v337_v38  ;;  %360 = vmatpush1.bf16.msra.mxu1 %v337_v38 }
  0x40   :  { %340 = vmatprep.subr.bf16.mxu0 %v339_v39  ;;  %353 = vmatprep.subr.bf16.mxu1 %v339_v39 }
  0x43   :  { %342 = vmatpush1.bf16.msra.mxu0 %v341_v44  ;;  %361 = vmatpush1.bf16.msra.mxu1 %v341_v44 }
  0x44   :  { %344 = vmatprep.subr.bf16.mxu0 %v343_v45  ;;  %354 = vmatprep.subr.bf16.mxu1 %v343_v45 }
  0x47   :  { %346 = vmatpush1.bf16.msra.mxu0 %v345_v48  ;;  %362 = vmatpush1.bf16.msra.mxu1 %v345_v48 }
  0x4a   :  { %168 = vmatmul.mubr.f32.vlgmr.msra.gmra.mrb[0].mxu0 %v43_v49  ;;  %216 = vmatmul.mubr.f32.vlgmr.msra.gmra.mrb[0].mxu1 %v51_v50 }
  0x4b   :  { %173 = vmatprep.mubr.f32.mxu0 %v449_v0  ;;  %221 = vmatprep.mubr.f32.mxu1 %v449_v0 }
  0x4e   :  { %174 = vmatmul.mubr.f32.gmra.mrb[2].mxu0 %v44_v51  ;;  %222 = vmatmul.mubr.f32.gmra.mrb[2].mxu1 %v52_v52 }
  0x4f   :  { %179 = vmatprep.mubr.f32.mxu0 %v449_v0  ;;  %227 = vmatprep.mubr.f32.mxu1 %v449_v0 }
  0x52   :  { %180 = vmatmul.mubr.f32.gmra.mrb[4].mxu0 %v45_v53  ;;  %228 = vmatmul.mubr.f32.gmra.mrb[4].mxu1 %v53_v54 }
  0x53   :  { %185 = vmatprep.mubr.f32.mxu0 %v449_v0  ;;  %233 = vmatprep.mubr.f32.mxu1 %v449_v0 }
  0x56   :  { %186 = vmatmul.mubr.f32.gmra.mrb[6].mxu0 %v46_v55  ;;  %234 = vmatmul.mubr.f32.gmra.mrb[6].mxu1 %v54_v56 }
  0x57   :  { %191 = vmatprep.mubr.f32.mxu0 %v449_v0  ;;  %239 = vmatprep.mubr.f32.mxu1 %v449_v0 }
  0x5a   :  { %192 = vmatmul.mubr.f32.gmra.mrb[8].mxu0 %v47_v57  ;;  %240 = vmatmul.mubr.f32.gmra.mrb[8].mxu1 %v55_v58 }
  0x5b   :  { %197 = vmatprep.mubr.f32.mxu0 %v449_v0  ;;  %245 = vmatprep.mubr.f32.mxu1 %v449_v0 }
  0x5e   :  { %198 = vmatmul.mubr.f32.gmra.mrb[10].mxu0 %v48_v59  ;;  %246 = vmatmul.mubr.f32.gmra.mrb[10].mxu1 %v56_v60 }
  0x5f   :  { %203 = vmatprep.mubr.f32.mxu0 %v449_v0  ;;  %251 = vmatprep.mubr.f32.mxu1 %v449_v0 }
  0x62   :  { %204 = vmatmul.mubr.f32.gmra.mrb[12].mxu0 %v49_v61  ;;  %252 = vmatmul.mubr.f32.gmra.mrb[12].mxu1 %v57_v62 }
  0x63   :  { %209 = vmatprep.mubr.f32.mxu0 %v449_v0  ;;  %257 = vmatprep.mubr.f32.mxu1 %v449_v0 }
  0x66   :  { %210 = vmatmul.mubr.f32.gmra.mrb[14].mxu0 %v50_v63  ;;  %258 = vmatmul.mubr.f32.gmra.mrb[14].mxu1 %v58_v1 }
 0x11d   :  { %v169_v9 = vpop.f32.mrb[0].mxu0  ;;  %v217_v10 = vpop.f32.mrb[0].mxu1 }
 0x11e   :  { %v170_v0 = vadd.f32 %v169_v9, %v517_v7  ;;  %v218_v11 = vadd.f32 %v217_v10, %v517_v7  ;;  %v171_v12 = vpop.f32.mrb[1].mxu0  ;;  %v219_v13 = vpop.f32.mrb[1].mxu1 }
 0x11f   :  { %v172_v14 = vadd.f32 %v171_v12, %v519_v8  ;;  %v220_v15 = vadd.f32 %v219_v13, %v519_v8 }
 0x120   :  { %264 = vst [vmem:[#allocation7] sm:$0xff] %v170_v0  ;;  %272 = vst [vmem:[#allocation7 + $0x80] sm:$0xff] %v218_v11 }
 0x121   :  { %281 = vst [vmem:[#allocation7 + $0x8] sm:$0xff] %v172_v14  ;;  %289 = vst [vmem:[#allocation7 + $0x88] sm:$0xff] %v220_v15  ;;  %v175_v16 = vpop.f32.mrb[2].mxu0  ;;  %v223_v17 = vpop.f32.mrb[2].mxu1 }
 0x122   :  { %v176_v18 = vadd.f32 %v175_v16, %v517_v7  ;;  %v224_v19 = vadd.f32 %v223_v17, %v517_v7  ;;  %v177_v20 = vpop.f32.mrb[3].mxu0  ;;  %v225_v21 = vpop.f32.mrb[3].mxu1 }
 0x123   :  { %v178_v22 = vadd.f32 %v177_v20, %v519_v8  ;;  %v226_v23 = vadd.f32 %v225_v21, %v519_v8 }
 0x124   :  { %265 = vst [vmem:[#allocation7 + $0x10] sm:$0xff] %v176_v18  ;;  %273 = vst [vmem:[#allocation7 + $0x90] sm:$0xff] %v224_v19 }
 0x125   :  { %282 = vst [vmem:[#allocation7 + $0x18] sm:$0xff] %v178_v22  ;;  %290 = vst [vmem:[#allocation7 + $0x98] sm:$0xff] %v226_v23  ;;  %v181_v24 = vpop.f32.mrb[4].mxu0  ;;  %v229_v25 = vpop.f32.mrb[4].mxu1 }
 0x126   :  { %v182_v26 = vadd.f32 %v181_v24, %v517_v7  ;;  %v230_v27 = vadd.f32 %v229_v25, %v517_v7  ;;  %v183_v28 = vpop.f32.mrb[5].mxu0  ;;  %v231_v29 = vpop.f32.mrb[5].mxu1 }
 0x127   :  { %v184_v30 = vadd.f32 %v183_v28, %v519_v8  ;;  %v232_v31 = vadd.f32 %v231_v29, %v519_v8 }
 0x128   :  { %266 = vst [vmem:[#allocation7 + $0x20] sm:$0xff] %v182_v26  ;;  %274 = vst [vmem:[#allocation7 + $0xa0] sm:$0xff] %v230_v27 }
 0x129   :  { %283 = vst [vmem:[#allocation7 + $0x28] sm:$0xff] %v184_v30  ;;  %291 = vst [vmem:[#allocation7 + $0xa8] sm:$0xff] %v232_v31  ;;  %v187_v32 = vpop.f32.mrb[6].mxu0  ;;  %v235_v33 = vpop.f32.mrb[6].mxu1 }
 0x12a   :  { %v188_v34 = vadd.f32 %v187_v32, %v517_v7  ;;  %v236_v35 = vadd.f32 %v235_v33, %v517_v7  ;;  %v189_v36 = vpop.f32.mrb[7].mxu0  ;;  %v237_v37 = vpop.f32.mrb[7].mxu1 }
 0x12b   :  { %v190_v38 = vadd.f32 %v189_v36, %v519_v8  ;;  %v238_v39 = vadd.f32 %v237_v37, %v519_v8 }
 0x12c   :  { %267 = vst [vmem:[#allocation7 + $0x30] sm:$0xff] %v188_v34  ;;  %275 = vst [vmem:[#allocation7 + $0xb0] sm:$0xff] %v236_v35 }
 0x12d   :  { %284 = vst [vmem:[#allocation7 + $0x38] sm:$0xff] %v190_v38  ;;  %292 = vst [vmem:[#allocation7 + $0xb8] sm:$0xff] %v238_v39  ;;  %v193_v40 = vpop.f32.mrb[8].mxu0  ;;  %v241_v41 = vpop.f32.mrb[8].mxu1 }
 0x12e   :  { %v194_v42 = vadd.f32 %v193_v40, %v517_v7  ;;  %v242_v43 = vadd.f32 %v241_v41, %v517_v7  ;;  %v195_v44 = vpop.f32.mrb[9].mxu0  ;;  %v243_v45 = vpop.f32.mrb[9].mxu1 }
 0x12f   :  { %v196_v46 = vadd.f32 %v195_v44, %v519_v8  ;;  %v244_v47 = vadd.f32 %v243_v45, %v519_v8 }
 0x130   :  { %268 = vst [vmem:[#allocation7 + $0x40] sm:$0xff] %v194_v42  ;;  %276 = vst [vmem:[#allocation7 + $0xc0] sm:$0xff] %v242_v43 }
 0x131   :  { %285 = vst [vmem:[#allocation7 + $0x48] sm:$0xff] %v196_v46  ;;  %293 = vst [vmem:[#allocation7 + $0xc8] sm:$0xff] %v244_v47  ;;  %v199_v48 = vpop.f32.mrb[10].mxu0  ;;  %v247_v49 = vpop.f32.mrb[10].mxu1 }
 0x132   :  { %v200_v50 = vadd.f32 %v199_v48, %v517_v7  ;;  %v248_v51 = vadd.f32 %v247_v49, %v517_v7  ;;  %v201_v52 = vpop.f32.mrb[11].mxu0  ;;  %v249_v53 = vpop.f32.mrb[11].mxu1 }
 0x133   :  { %v202_v54 = vadd.f32 %v201_v52, %v519_v8  ;;  %v250_v55 = vadd.f32 %v249_v53, %v519_v8 }
 0x134   :  { %269 = vst [vmem:[#allocation7 + $0x50] sm:$0xff] %v200_v50  ;;  %277 = vst [vmem:[#allocation7 + $0xd0] sm:$0xff] %v248_v51 }
 0x135   :  { %286 = vst [vmem:[#allocation7 + $0x58] sm:$0xff] %v202_v54  ;;  %294 = vst [vmem:[#allocation7 + $0xd8] sm:$0xff] %v250_v55  ;;  %v205_v56 = vpop.f32.mrb[12].mxu0  ;;  %v253_v57 = vpop.f32.mrb[12].mxu1 }
 0x136   :  { %v206_v58 = vadd.f32 %v205_v56, %v517_v7  ;;  %v254_v59 = vadd.f32 %v253_v57, %v517_v7  ;;  %v207_v60 = vpop.f32.mrb[13].mxu0  ;;  %v255_v61 = vpop.f32.mrb[13].mxu1 }
 0x137   :  { %v208_v62 = vadd.f32 %v207_v60, %v519_v8  ;;  %v256_v63 = vadd.f32 %v255_v61, %v519_v8 }
 0x138   :  { %270 = vst [vmem:[#allocation7 + $0x60] sm:$0xff] %v206_v58  ;;  %278 = vst [vmem:[#allocation7 + $0xe0] sm:$0xff] %v254_v59 }
 0x139   :  { %287 = vst [vmem:[#allocation7 + $0x68] sm:$0xff] %v208_v62  ;;  %295 = vst [vmem:[#allocation7 + $0xe8] sm:$0xff] %v256_v63  ;;  %v211_v1 = vpop.f32.mrb[14].mxu0  ;;  %v259_v2 = vpop.f32.mrb[14].mxu1 }
 0x13a   :  { %v212_v3 = vadd.f32 %v211_v1, %v517_v7  ;;  %v260_v4 = vadd.f32 %v259_v2, %v517_v7  ;;  %v213_v5 = vpop.f32.mrb[15].mxu0  ;;  %v261_v6 = vpop.f32.mrb[15].mxu1 }
 0x13b   :  { %v214_v9 = vadd.f32 %v213_v5, %v519_v8  ;;  %v262_v10 = vadd.f32 %v261_v6, %v519_v8 }
 0x13c   :  { %271 = vst [vmem:[#allocation7 + $0x70] sm:$0xff] %v212_v3  ;;  %279 = vst [vmem:[#allocation7 + $0xf0] sm:$0xff] %v260_v4 }
 0x13d   :  { %288 = vst [vmem:[#allocation7 + $0x78] sm:$0xff] %v214_v9  ;;  %296 = vst [vmem:[#allocation7 + $0xf8] sm:$0xff] %v262_v10 }
 0x13e   :  { %426 = shalt.err (!%p423_p6)
}
 0x13f   :  { %s427_s17 = scalar_lea.hbm %s571_s3, 4096 }
 0x140   :  { %p428_p7 = scmp.ne.s32.totalorder %s571_s3, %s427_s17  ;;  %p431_p8 = scmp.lt.u32.totalorder %s427_s17, %s571_s3 }
 0x142   :  { %p433_p9 = pnand %p431_p8, %p428_p7 }
 0x144   :  { %436 = shalt.err (!%p433_p9)
}
 0x145   :  { %308 = dma.vmem_to_hbm [thread:$0]  %s303_s13, 4096, %s571_s3, [#allocation4], %s444_s22, %s444_s22, %s445_s23  }
 0x146   :  { %441 = dma.done.wait [#allocation4], 4096  }
 0x147   :  { %442 = vsyncadd [#allocation4], 4294963200 }
 0x148   :  { %312 = vsyncpa [#allocation3], 1 }
 0x149   :  { %313 = vsyncpa [#allocation6], 1 }
 0x14a   :  { %314 = vsyncpa [#allocation4], 1 }

</bundles_post_ra>
